<compile_context>
chip_gen: v5e
topology: v5e:2x2
jax: 0.10.0
libtpu: 0.0.40
codegen_flags: <defaults>
</compile_context>

<pallas_src>
import numpy as np
import jax
import jax.numpy as jnp
from jax.experimental import pallas as pl
from jax.experimental.pallas import tpu as pltpu


# ----------------------------------------------------------------------------
# Wrapper (host-side BSR schedule prep) + Pallas kernel
# ----------------------------------------------------------------------------
def sparse_bsr_linear(x, crow_indices, col_indices, values, bias,
                      in_features, out_features, block_size,
                      blocks_per_step=8, batch_tile=256):
    """y = x @ W_bsr.T + bias, W_bsr given in BSR format."""
    assert in_features % block_size == 0 and out_features % block_size == 0
    bs = block_size
    n_brows = out_features // bs
    n_bcols = in_features // bs

    crow = np.asarray(crow_indices, dtype=np.int64)
    col = np.asarray(col_indices, dtype=np.int64)
    vals = np.asarray(values, dtype=np.float32).reshape(-1, bs, bs)
    assert crow.shape[0] == n_brows + 1
    assert int(crow[0]) == 0 and int(crow[-1]) == col.shape[0]
    assert np.all(np.diff(crow) >= 0), "BSR crow_indices must be non-decreasing"

    # ---- nnz-based schedule (host side; in production cache this per weight). ----
    row_nnz = np.diff(crow)
    max_nnz = int(row_nnz.max()) if row_nnz.size else 0
    K = max(1, min(int(blocks_per_step), max(max_nnz, 1)))       # blocks fused per step
    # >=1 step per row so empty rows still get their bias written.
    steps_per_row = np.maximum(1, -(-row_nnz // K))
    S = int(steps_per_row.sum())

    srow = np.zeros((S,), np.int32)        # block row owned by each step
    sstart = np.zeros((S,), np.int32)      # 1 on the first step of a block row
    bcol = np.zeros((S * K,), np.int32)    # block column per (step, slot); pads -> 0
    wsteps = np.zeros((S, K * bs, bs), np.float32)  # K transposed blocks stacked per step

    s = 0
    for r in range(n_brows):
        p0, p1 = int(crow[r]), int(crow[r + 1])
        for t in range(int(steps_per_row[r])):
            srow[s] = r
            sstart[s] = 1 if t == 0 else 0
            for k in range(K):
                p = p0 + t * K + k
                if p < p1:
                    wsteps[s, k * bs:(k + 1) * bs, :] = vals[p].T   # host-side transpose
                    bcol[s * K + k] = int(col[p])
            s += 1
    assert s == S

    wsteps_j = jnp.asarray(wsteps, dtype=jnp.bfloat16)     # (S, K*bs, bs)
    srow_j = jnp.asarray(srow)                             # SMEM scalar prefetch
    sstart_j = jnp.asarray(sstart)
    bcol_j = jnp.asarray(bcol)

    # ---- batch padding (multiple of 16) and tiling (parallel grid axis). ----
    B = x.shape[0]
    B16 = -(-B // 16) * 16
    B_tile = -(-min(int(batch_tile), B16) // 16) * 16
    n_bt = -(-B // B_tile)
    B_pad = n_bt * B_tile

    xj = jnp.asarray(x, dtype=jnp.float32)
    if B_pad != B:
        xj = jnp.pad(xj, ((0, B_pad - B), (0, 0)))
    # x resident as column blocks: (n_bcols, B_pad, bs) bf16.
    x_blocks = jnp.transpose(
        xj.astype(jnp.bfloat16).reshape(B_pad, n_bcols, bs), (1, 0, 2))
    bias2d = jnp.asarray(bias, dtype=jnp.float32).reshape(1, out_features)

    # ---- explicit VMEM budget (buffers + headroom), capped for all TPU gens. ----
    vmem_needed = (
        2 * n_bcols * B_tile * bs * 2      # x column blocks (double-buffered bf16)
        + 2 * K * bs * bs * 2              # weight slab (double-buffered bf16)
        + 2 * B_tile * bs * 4              # output block (double-buffered f32)
        + 2 * bs * 4                       # bias block
        + B_tile * K * bs * 2              # LHS gather scratch (bf16)
    )
    vmem_limit = int(min(max(2 * vmem_needed + (4 << 20), 32 << 20), 48 << 20))

    def kernel(srow_ref, sstart_ref, bcol_ref, w_ref, x_ref, bias_ref,
               out_ref, lhs_ref):
        s = pl.program_id(1)

        # First step of a block row: seed the (f32) output block with the bias.
        @pl.when(sstart_ref[s] == 1)
        def _():
            out_ref[...] = jnp.broadcast_to(bias_ref[...], out_ref.shape)

        # Gather K x column blocks (dynamic leading-dim index from SMEM) into one
        # (B_tile, K*bs) LHS, then a single deep MXU contraction against the
        # pre-stacked (K*bs, bs) transposed weights; accumulate into the output.
        base = s * K
        for k in range(K):
            c = bcol_ref[base + k]
            lhs_ref[:, k * bs:(k + 1) * bs] = x_ref[c]
        out_ref[...] += jnp.dot(lhs_ref[...], w_ref[0],
                                preferred_element_type=jnp.float32)

    grid_spec = pltpu.PrefetchScalarGridSpec(
        num_scalar_prefetch=3,
        grid=(n_bt, S),
        in_specs=[
            # Per-step fused weight slab: (1, K*bs, bs)
            pl.BlockSpec((1, K * bs, bs), lambda bt, s, sr, st, bc: (s, 0, 0)),
            # x column blocks for the current batch tile (resident across s)
            pl.BlockSpec((n_bcols, B_tile, bs), lambda bt, s, sr, st, bc: (0, bt, 0)),
            # bias slice for the current output block row (data-dependent index)
            pl.BlockSpec((1, bs), lambda bt, s, sr, st, bc: (0, sr[s])),
        ],
        out_specs=pl.BlockSpec((B_tile, bs), lambda bt, s, sr, st, bc: (bt, sr[s])),
        scratch_shapes=[pltpu.VMEM((B_tile, K * bs), jnp.bfloat16)],
    )

    y_pad = pl.pallas_call(
        kernel,
        out_shape=jax.ShapeDtypeStruct((B_pad, out_features), jnp.float32),
        grid_spec=grid_spec,
        compiler_params=pltpu.CompilerParams(
            dimension_semantics=("parallel", "arbitrary"),
            vmem_limit_bytes=vmem_limit),
    )(srow_j, sstart_j, bcol_j, wsteps_j, x_blocks, bias2d)

    return y_pad[:B]


# ----------------------------------------------------------------------------
# Reference (dense) for verification
# ----------------------------------------------------------------------------
def _bsr_to_dense(crow, col, vals, out_f, in_f, bs):
    W = np.zeros((out_f, in_f), dtype=np.float32)
    vals = np.asarray(vals, dtype=np.float32).reshape(-1, bs, bs)
    for r in range(out_f // bs):
        for p in range(int(crow[r]), int(crow[r + 1])):
            c = int(col[p])
            W[r * bs:(r + 1) * bs, c * bs:(c + 1) * bs] = vals[p]
    return W


if __name__ == "__main__":
    # Small, deterministic problem. block_size=128 keeps block tiles lane-aligned;
    # batch=16 matches bf16 sublane packing.
    batch = 16
    block_size = 128
    in_features = 512      # 4 block cols
    out_features = 384     # 3 block rows

    # BSR sparsity pattern:
    #   row 0 -> cols [0, 1, 3]
    #   row 1 -> []            (empty row -> bias only, via its single zero step)
    #   row 2 -> cols [2, 0]   (partially filled step -> zero-padded slots)
    crow_indices = [0, 3, 3, 5]
    col_indices = [0, 1, 3, 2, 0]
    nnz = len(col_indices)

    key = jax.random.PRNGKey(0)
    k_vals, k_bias, k_x = jax.random.split(key, 3)
    values = jax.random.normal(
        k_vals, (nnz, block_size, block_size), dtype=jnp.float32) * 0.05
    bias = jax.random.normal(k_bias, (out_features,), dtype=jnp.float32)
    x = jax.random.normal(k_x, (batch, in_features), dtype=jnp.float32)

    y = sparse_bsr_linear(x, crow_indices, col_indices, values, bias,
                          in_features, out_features, block_size)
    y = jax.block_until_ready(y)

    # Dense reference with the same bf16 input rounding, f32 accumulation.
    W_dense = _bsr_to_dense(np.asarray(crow_indices), np.asarray(col_indices),
                            np.asarray(values), out_features, in_features,
                            block_size)
    W_bf = np.asarray(jnp.asarray(W_dense).astype(jnp.bfloat16).astype(jnp.float32))
    x_bf = np.asarray(jnp.asarray(x).astype(jnp.bfloat16).astype(jnp.float32))
    y_ref = x_bf @ W_bf.T + np.asarray(bias)[None, :]

    np.testing.assert_allclose(np.asarray(y), y_ref, rtol=1e-2, atol=1e-2)
    print("KERNEL_OK")
</pallas_src>

<mosaic_0001>
module attributes {stable_mosaic.version = 11 : i64} {
  func.func @kernel(%arg0: i32, %arg1: i32, %arg2: memref<3xi32, #tpu.memory_space<smem>>, %arg3: memref<3xi32, #tpu.memory_space<smem>>, %arg4: memref<9xi32, #tpu.memory_space<smem>>, %arg5: memref<1x384x128xbf16, #tpu.memory_space<vmem>>, %arg6: memref<4x16x128xbf16, #tpu.memory_space<vmem>>, %arg7: memref<1x128xf32, #tpu.memory_space<vmem>>, %arg8: memref<16x128xf32, #tpu.memory_space<vmem>>, %arg9: memref<16x384xbf16, #tpu.memory_space<vmem>>) attributes {dimension_semantics = [#tpu.dimension_semantics<parallel>, #tpu.dimension_semantics<arbitrary>], iteration_bounds = array<i64: 1, 3>, scalar_prefetch = 3 : i64, scratch_operands = 1 : i64, tpu.core_type = #tpu.core_type<tc>, window_params = [{transform_indices = @transform_0, window_bounds = array<i64: 1, 384, 128>}, {transform_indices = @transform_1, window_bounds = array<i64: 4, 16, 128>}, {transform_indices = @transform_2, window_bounds = array<i64: 1, 128>}, {transform_indices = @transform_3, window_bounds = array<i64: 16, 128>}]} {
    %0 = arith.index_cast %arg1 : i32 to index
    %1 = memref.load %arg3[%0] : memref<3xi32, #tpu.memory_space<smem>>
    %c1_i32 = arith.constant 1 : i32
    %2 = arith.cmpi eq, %1, %c1_i32 : i32
    %3 = arith.extui %2 : i1 to i32
    %c0_i32 = arith.constant 0 : i32
    %4 = arith.cmpi ne, %3, %c0_i32 : i32
    scf.if %4 {
      %c0_20 = arith.constant 0 : index
      %c0_21 = arith.constant 0 : index
      %34 = vector.load %arg7[%c0_20, %c0_21] : memref<1x128xf32, #tpu.memory_space<vmem>>, vector<1x128xf32>
      %35 = vector.shape_cast %34 : vector<1x128xf32> to vector<1x128xf32>
      %36 = vector.broadcast %35 : vector<1x128xf32> to vector<16x128xf32>
      %c0_22 = arith.constant 0 : index
      %c0_23 = arith.constant 0 : index
      %37 = vector.load %arg8[%c0_22, %c0_23] : memref<16x128xf32, #tpu.memory_space<vmem>>, vector<16x128xf32>
      tpu.vector_store %arg8[%c0_22, %c0_23], %36 {strides = array<i32>} : memref<16x128xf32, #tpu.memory_space<vmem>>, vector<16x128xf32>,
    } else {
    }
    %c3_i32 = arith.constant 3 : i32
    %5 = arith.muli %arg1, %c3_i32 : i32
    %c0_i32_0 = arith.constant 0 : i32
    %6 = arith.addi %5, %c0_i32_0 : i32
    %7 = arith.index_cast %6 : i32 to index
    %8 = memref.load %arg4[%7] : memref<9xi32, #tpu.memory_space<smem>>
    %9 = arith.index_cast %8 : i32 to index
    %c0 = arith.constant 0 : index
    %c0_1 = arith.constant 0 : index
    %10 = vector.load %arg6[%9, %c0, %c0_1] : memref<4x16x128xbf16, #tpu.memory_space<vmem>>, vector<1x16x128xbf16>
    %11 = vector.shape_cast %10 : vector<1x16x128xbf16> to vector<16x128xbf16>
    %c0_2 = arith.constant 0 : index
    %c0_3 = arith.constant 0 : index
    %12 = vector.load %arg9[%c0_2, %c0_3] : memref<16x384xbf16, #tpu.memory_space<vmem>>, vector<16x128xbf16>
    tpu.vector_store %arg9[%c0_2, %c0_3], %11 {strides = array<i32>} : memref<16x384xbf16, #tpu.memory_space<vmem>>, vector<16x128xbf16>,
    %c1_i32_4 = arith.constant 1 : i32
    %13 = arith.addi %5, %c1_i32_4 : i32
    %14 = arith.index_cast %13 : i32 to index
    %15 = memref.load %arg4[%14] : memref<9xi32, #tpu.memory_space<smem>>
    %16 = arith.index_cast %15 : i32 to index
    %c0_5 = arith.constant 0 : index
    %c0_6 = arith.constant 0 : index
    %17 = vector.load %arg6[%16, %c0_5, %c0_6] : memref<4x16x128xbf16, #tpu.memory_space<vmem>>, vector<1x16x128xbf16>
    %18 = vector.shape_cast %17 : vector<1x16x128xbf16> to vector<16x128xbf16>
    %c0_7 = arith.constant 0 : index
    %c128 = arith.constant 128 : index
    %19 = vector.load %arg9[%c0_7, %c128] : memref<16x384xbf16, #tpu.memory_space<vmem>>, vector<16x128xbf16>
    tpu.vector_store %arg9[%c0_7, %c128], %18 {strides = array<i32>} : memref<16x384xbf16, #tpu.memory_space<vmem>>, vector<16x128xbf16>,
    %c2_i32 = arith.constant 2 : i32
    %20 = arith.addi %5, %c2_i32 : i32
    %21 = arith.index_cast %20 : i32 to index
    %22 = memref.load %arg4[%21] : memref<9xi32, #tpu.memory_space<smem>>
    %23 = arith.index_cast %22 : i32 to index
    %c0_8 = arith.constant 0 : index
    %c0_9 = arith.constant 0 : index
    %24 = vector.load %arg6[%23, %c0_8, %c0_9] : memref<4x16x128xbf16, #tpu.memory_space<vmem>>, vector<1x16x128xbf16>
    %25 = vector.shape_cast %24 : vector<1x16x128xbf16> to vector<16x128xbf16>
    %c0_10 = arith.constant 0 : index
    %c256 = arith.constant 256 : index
    %26 = vector.load %arg9[%c0_10, %c256] : memref<16x384xbf16, #tpu.memory_space<vmem>>, vector<16x128xbf16>
    tpu.vector_store %arg9[%c0_10, %c256], %25 {strides = array<i32>} : memref<16x384xbf16, #tpu.memory_space<vmem>>, vector<16x128xbf16>,
    %c0_11 = arith.constant 0 : index
    %c0_12 = arith.constant 0 : index
    %27 = vector.load %arg8[%c0_11, %c0_12] : memref<16x128xf32, #tpu.memory_space<vmem>>, vector<16x128xf32>
    %c0_13 = arith.constant 0 : index
    %c0_14 = arith.constant 0 : index
    %28 = vector.load %arg9[%c0_13, %c0_14] : memref<16x384xbf16, #tpu.memory_space<vmem>>, vector<16x384xbf16>
    %c0_15 = arith.constant 0 : index
    %c0_16 = arith.constant 0 : index
    %c0_17 = arith.constant 0 : index
    %29 = vector.load %arg5[%c0_15, %c0_16, %c0_17] : memref<1x384x128xbf16, #tpu.memory_space<vmem>>, vector<1x384x128xbf16>
    %30 = vector.shape_cast %29 : vector<1x384x128xbf16> to vector<384x128xbf16>
    %cst = arith.constant dense<0.000000e+00> : vector<16x128xf32>
    %31 = tpu.matmul %28, %30, %cst {dimension_numbers = #tpu.dot_dimension_numbers<[1], [0], [0], [1], [0, 0, 1, 1], [], []>} : vector<16x384xbf16>, vector<384x128xbf16>, vector<16x128xf32> -> vector<16x128xf32>
    %32 = arith.addf %27, %31 : vector<16x128xf32>
    %c0_18 = arith.constant 0 : index
    %c0_19 = arith.constant 0 : index
    %33 = vector.load %arg8[%c0_18, %c0_19] : memref<16x128xf32, #tpu.memory_space<vmem>>, vector<16x128xf32>
    tpu.vector_store %arg8[%c0_18, %c0_19], %32 {strides = array<i32>} : memref<16x128xf32, #tpu.memory_space<vmem>>, vector<16x128xf32>,
    return
  }
  func.func @transform_0(%arg0: i32, %arg1: i32, %arg2: memref<3xi32, #tpu.memory_space<smem>>, %arg3: memref<3xi32, #tpu.memory_space<smem>>, %arg4: memref<9xi32, #tpu.memory_space<smem>>) -> (i32, i32, i32) {
    %c0_i32 = arith.constant 0 : i32
    %c0_i32_0 = arith.constant 0 : i32
    %c0_i32_1 = arith.constant 0 : i32
    return %arg1, %c0_i32, %c0_i32_0 : i32, i32, i32
  }
  func.func @transform_1(%arg0: i32, %arg1: i32, %arg2: memref<3xi32, #tpu.memory_space<smem>>, %arg3: memref<3xi32, #tpu.memory_space<smem>>, %arg4: memref<9xi32, #tpu.memory_space<smem>>) -> (i32, i32, i32) {
    %c0_i32 = arith.constant 0 : i32
    %c0_i32_0 = arith.constant 0 : i32
    %c0_i32_1 = arith.constant 0 : i32
    return %c0_i32, %arg0, %c0_i32_0 : i32, i32, i32
  }
  func.func @transform_2(%arg0: i32, %arg1: i32, %arg2: memref<3xi32, #tpu.memory_space<smem>>, %arg3: memref<3xi32, #tpu.memory_space<smem>>, %arg4: memref<9xi32, #tpu.memory_space<smem>>) -> (i32, i32) {
    %0 = arith.index_cast %arg1 : i32 to index
    %1 = memref.load %arg2[%0] : memref<3xi32, #tpu.memory_space<smem>>
    %c0_i32 = arith.constant 0 : i32
    %c0_i32_0 = arith.constant 0 : i32
    return %c0_i32, %1 : i32, i32
  }
  func.func @transform_3(%arg0: i32, %arg1: i32, %arg2: memref<3xi32, #tpu.memory_space<smem>>, %arg3: memref<3xi32, #tpu.memory_space<smem>>, %arg4: memref<9xi32, #tpu.memory_space<smem>>) -> (i32, i32) {
    %0 = arith.index_cast %arg1 : i32 to index
    %1 = memref.load %arg2[%0] : memref<3xi32, #tpu.memory_space<smem>>
    %c0_i32 = arith.constant 0 : i32
    return %arg0, %1 : i32, i32
  }
}

</mosaic_0001>

<bundles_post_ra>
// kernel: tpu_custom_call.1
= control target key start
LH: loop header
LB: loop body
LE: loop exit
PB: predicated region body
PF: predicated region fallthrough
CT: control target
= control target key end

     0   :  { %s1183_s27 = smov [#allocation4]   ;;  %s1184_s28 = smov [#allocation5]   ;;  %s1455_s0 = inlined_call_operand.hbm [shape: s32[3], index: 0, kind: input, shape index: {}]   ;;  %s1456_s3 = inlined_call_operand.hbm [shape: bf16[3,384,128], index: 3, kind: input, shape index: {}]   ;;  %s1457_s4 = inlined_call_operand.hbm [shape: bf16[4,16,128], index: 4, kind: input, shape index: {}]   ;;  %s1458_s5 = inlined_call_operand.vmem [shape: f32[1,384], index: 5, kind: input, shape index: {}]   ;;  %s1459_s6 = inlined_call_operand.hbm [shape: f32[16,384], index: 6, kind: output, shape index: {}]   ;;  %s1460_s1 = inlined_call_operand.hbm [shape: s32[3], index: 1, kind: input, shape index: {}]   ;;  %s1461_s2 = inlined_call_operand.vmem [shape: s32[9], index: 2, kind: input, shape index: {}]  }
   0x1   :  { %1468 = sst [smem:[#allocation22_spill]] %s1457_s4  ;;  %s12_s23 = sshll.u32 %s1455_s0, 4  ;;  %s13_s23 = int_to_ptr.hbm [resolvable:$true] %s12_s23 }
   0x2   :  { %s17_s26 = sshll.u32 %s1460_s1, 4  ;;  %s22_s7 = sshll.u32 %s1461_s2, 4  ;;  %s18_s26 = int_to_ptr.hbm [resolvable:$true] %s17_s26  ;;  %s23_s7 = int_to_ptr.vmem [resolvable:$true] %s22_s7 }
   0x3   :  { %15 = dma.hbm_to_smem %s13_s23, 16, %s1183_s27, [#allocation3] }
   0x4   :  { %20 = dma.hbm_to_smem %s18_s26, 16, %s1184_s28, [#allocation3] }
   0x5   :  { %s1185_s8 = smov [#allocation6]  }
   0x6   :  { %25 = dma.vmem_to_smem %s23_s7, 16, %s1185_s8, [#allocation3] }
   0x7   :  { %1133 = dma.done.wait [#allocation3], 48 }
   0x8   :  { %1134 = vsyncadd [#allocation3], 4294967248 }
   0x9   :  { %28 = sfence }
   0xa   :  { %29 = vsyncpa [#allocation8], 0 }
   0xb   :  { %31 = vsyncpa [#allocation8 + $0x1], 0 }
   0xc   :  { %32 = vsyncpa [#allocation11], 0 }
   0xd   :  { %33 = vsyncpa [#allocation9], 0 }
   0xe   :  { %35 = vsyncpa [#allocation9 + $0x1], 0  ;;  %s1236_s0 = smov 0   ;;  %s1238_s1 = smov 0  }
   0xf   :  { %s1240_s9 = smov 0   ;;  %s1242_s10 = smov 0  }
  0x10   :  { %s1244_s2 = smov 0   ;;  %s1246_s11 = smov 0  }
  0x11   :  { %s1248_s12 = smov 0   ;;  %s1250_s13 = smov 0  }
  0x12   :  { %s1252_s14 = smov 0  }
  0x13 LB: > { %1469 = sst [smem:[#allocation18_spill]] %s1149_s0  ;;  %s704_s15 = sadd.s32 4294967295, %s1181_s14   ;;  %s1181_s14 = sphi %s1252_s14, %s41_s14   ;;  %s1177_s13 = sphi %s1250_s13, %s1485_s13   ;;  %s1173_s12 = sphi %s1248_s12, %s1484_s12   ;;  %s1169_s11 = sphi %s1246_s11, %s1491_s11   ;;  %s1165_s2 = sphi %s1244_s2, %s1490_s2   ;;  %s1161_s10 = sphi %s1242_s10, %s1489_s10   ;;  %s1157_s9 = sphi %s1240_s9, %s1488_s9   ;;  %s1153_s1 = sphi %s1238_s1, %s1487_s1   ;;  %s1149_s0 = sphi %s1236_s0, %s1486_s0  }
  0x14   : > { %1470 = sst [smem:[#allocation19_spill]] %s1177_s13  ;;  %s705_s16 = sadd.s32 4294967294, %s1181_s14  }
  0x15   : > { %p73_p0 = scmp.ne.s32.totalorder %s1165_s2, %s1161_s10  ;;  %p1282_p1 = scmp.eq.s32.totalorder %s704_s15, 0 }
  0x16   : > { %p154_p2 = scmp.ne.s32.totalorder %s1157_s9, %s1153_s1  ;;  %p155_p4 = scmp.eq.s32.totalorder %s704_s15, 2 }
  0x17   : > { %p1291_p3 = por %p1282_p1, %p73_p0  ;;  %p160_p5 = scmp.ne.s32.totalorder %s1153_s1, %s1149_s0 }
  0x18   : > { %p161_p6 = scmp.eq.s32.totalorder %s705_s16, 2  ;;  %p1297_p7 = por %p155_p4, %p154_p2 }
  0x19   : > { %p706_p8 = scmp.ge.s32.totalorder %s1181_s14, 1  ;;  %p168_p10 = scmp.lt.s32.totalorder %s1181_s14, 4 }
  0x1a   : > { %p1302_p9 = por %p161_p6, %p160_p5  ;;  %s1476_s4 = sld [smem:[#allocation22_spill]] }
  0x1b   : > { %p1310_p11 = pnand %p706_p8, %p168_p10  ;;  %s1186_s26 = smov [#allocation10]  }
  0x1c   : > { %s1474_s21 = scalar_select %p1302_p9, 1, 0 }
  0x1d   : > { %p875_p12 = pneg %p1310_p11  ;;  %s184_s27 = sshll.u32 %s1186_s26, 4  ;;  %s185_s27 = int_to_ptr.vmem [resolvable:$true] %s184_s27 }
  0x1e   : > { %1475 = sst [smem:[#allocation20_spill]] %s1474_s21  ;;  %s1462_s28 = smov 64  }
  0x1f   : > { %p876_p13 = pnand %p875_p12, %p1282_p1  ;;  %s1463_s29 = smov 4  }
  0x20   : > { %s182_s24 = sshll.u32 %s1476_s4, 4  ;;  %s50_s30 = sadd.s32 1, %s1177_s13  ;;  %s183_s24 = int_to_ptr.hbm [resolvable:$true] %s182_s24 }
  0x21   : > { %878 = dma.hbm_to_vmem [thread:$0]  (!%p876_p13), %s183_s24, 512, %s185_s27, [#allocation11], %s1462_s28, %s1462_s28, %s1463_s29  }
  0x22   : > { %p51_p0 = scmp.ge.s32.totalorder %s50_s30, 3  ;;  %s60_s7 = sadd.s32 1, %s1169_s11 }
  0x23   : > { %p67_p2 = scmp.ne.s32.totalorder %s1169_s11, %s1165_s2  ;;  %p68_p4 = scmp.eq.s32.totalorder %s1181_s14, 0 }
  0x24   : > { %s1493_s30 = smov (%p51_p0, %s50_s30), 0  ;;  %s137_s8 = sld [smem:[#allocation4 + %s1177_s13]] }
  0x25   : > { %1478 = sst [smem:[#allocation21_spill]] %s1493_s30  ;;  %p69_p5 = por %p68_p4, %p67_p2 }
  0x26   : > { %s57_s10 = ssub.s32 %s1177_s13, %s1493_s30  ;;  %s138_s15 = sld [smem:[#allocation4 + %s1493_s30]] }
  0x27   : > { %p58_p6 = scmp.eq.s32.totalorder %s57_s10, 0  ;;  %p888_p8 = scmp.lt.s32.totalorder %s1181_s14, 3 }
  0x28   : > { %s198_s16 = sand.u32 1, %s1169_s11   ;;  %s863_s22 = smul.u32 192, %s1177_s13 }
  0x29   : > { %s1336_s23 = scalar_select %p58_p6, %s1169_s11, %s60_s7  }
  0x2a   : > { %s862_s24 = smul.u32 192, %s198_s16  ;;  %s207_s28 = scalar_lea.hbm %s1456_s3, %s863_s22 }
  0x2b   : > { %p880_p10 = pnand %p888_p8, %p69_p5  ;;  %s208_s18 = sshll.u32 %s207_s28, 4  ;;  %s209_s18 = int_to_ptr.hbm [resolvable:$true] %s208_s18 }
  0x2c   : > { %s140_s29 = ssub.s32 %s137_s8, %s138_s15  ;;  %s202_s4 = scalar_lea.vmem [#allocation7], %s862_s24 }
  0x2d   : > { %p142_p12 = scmp.eq.s32.totalorder %s140_s29, 0  ;;  %s210_s21 = sshll.u32 %s202_s4, 4  ;;  %s211_s21 = int_to_ptr.vmem [resolvable:$true] %s210_s21 }
  0x2e   : > { %s1479_s0 = sadd.s32 1, %s1157_s9  ;;  %s199_s10 = scalar_lea.sflag [#allocation8], %s198_s16 }
  0x2f   : > { %s1344_s30 = scalar_select %p142_p12, %s1157_s9, %s1479_s0  }
  0x30   : > { %s1480_s13 = smov 4   ;;  %s1481_s7 = smov 64  }
  0x31   : > { %882 = dma.hbm_to_vmem [thread:$0]  (!%p880_p10), %s209_s18, 3072, %s211_s21, %s199_s10, %s1481_s7, %s1481_s7, %s1480_s13  }
  0x32   : > { %230 = sbr.rel (%p1310_p11) target bundleno = 258 (0x102), region = 32  ;;  %s232_s8 = sand.u32 (!%p1310_p11), 1, %s1165_s2  }
  0x33   : > { %s864_s29 = smul.u32 (!%p1310_p11), 192, %s232_s8  ;;  %s233_s28 = scalar_lea.sflag (!%p1310_p11), [#allocation8], %s232_s8 }
  0x35   : > { %s1352_s15 = scalar_lea.vmem (!%p1310_p11), [#allocation7], %s864_s29 }
  0x37   : > { %1136 = dma.done.wait (%p1291_p3), %s233_s28, 3072  }
  0x38   : > { %1138 = vsyncadd (%p1291_p3), %s233_s28, 4294964224 }
  0x39   : > { %1140 = dma.done.wait (%p1282_p1), [#allocation11], 512  }
  0x3a   : > { %1142 = vsyncadd (%p1282_p1), [#allocation11], 4294966784  ;;  %s266_s4 = sand.u32 1, %s1153_s1   ;;  %s270_s0 = sld [smem:[#allocation4 + %s1173_s12]] }
  0x3b   : > { %s712_s13 = sshll.u32 %s266_s4, 4  ;;  %s277_s18 = sld [smem:[#allocation5 + %s1173_s12]] }
  0x3c   : > { %s1370_s16 = scalar_lea.vmem [#allocation12], %s712_s13 }
  0x40   : > { %p271_p11 = scmp.lt.s32.totalorder %s270_s0, 2 }
  0x41   : > { %p713_p3 = scmp.ne.s32.totalorder %s277_s18, 1 }
  0x42   : > { %s1495_s0 = smov (!%p271_p11, %s270_s0), 2 }
  0x43   : > { %s273_s25 = scalar_lea.vmem %s1458_s5, %s1495_s0  ;;  %281 = sbr.rel (%p713_p3) target bundleno = 75 (0x4b), region = 44 }
  0x48   : > { %v972_v0 = vld [vmem:[%s273_s25] ss:$0 sm:$0xff] }
  0x49   : > { %286 = vst [vmem:[%s1370_s16] sm:$0xff] %v972_v0 }
  0x4a   : > { %287 = vst [vmem:[%s1370_s16 + $0x8] sm:$0xff] %v972_v0 }
  0x4b PF: > { %v845_v1 = vld [vmem:[%s1352_s15 + $0x38] sm:$0xff]  ;;  %s288_s17 = smul.u32 3, %s1173_s12  ;;  %v844_v4 = vld [vmem:[%s1352_s15 + $0x30] sm:$0xff]  ;;  %v843_v7 = vld [vmem:[%s1352_s15 + $0x28] sm:$0xff]  ;;  %s1497_s12 = smov (!%p1297_p7, %s1173_s12), 0 }
  0x4c   : > { %v853_v2 = vld [vmem:[%s1352_s15 + $0x78] sm:$0xff]  ;;  %529 = vmatpush.bf16.msra.mxu0 %v845_v1  ;;  %v852_v5 = vld [vmem:[%s1352_s15 + $0x70] sm:$0xff]  ;;  %v851_v8 = vld [vmem:[%s1352_s15 + $0x68] sm:$0xff]  ;;  %s871_s18 = scalar_select %p1297_p7, [#allocation4], [#allocation13] }
  0x4d   : > { %v861_v3 = vld [vmem:[%s1352_s15 + $0xb8] sm:$0xff]  ;;  %543 = vmatpush.bf16.msra.mxu1 %v853_v2  ;;  %s289_s22 = sld [smem:[#allocation6 + %s288_s17]]  ;;  %s297_s24 = sadd.s32 1, %s288_s17  ;;  %v860_v6 = vld [vmem:[%s1352_s15 + $0xb0] sm:$0xff]  ;;  %v859_v9 = vld [vmem:[%s1352_s15 + $0xa8] sm:$0xff] }
  0x4e   : > { %557 = vmatpush.bf16.msra.mxu2 %v861_v3  ;;  %s298_s26 = sld [smem:[#allocation6 + %s297_s24]]  ;;  %s306_s27 = sadd.s32 2, %s288_s17  ;;  %v842_v10 = vld [vmem:[%s1352_s15 + $0x20] sm:$0xff]  ;;  %v841_v19 = vld [vmem:[%s1352_s15 + $0x18] sm:$0xff]  ;;  %v840_v22 = vld [vmem:[%s1352_s15 + $0x10] sm:$0xff] }
  0x4f   : > { %s307_s10 = sld [smem:[#allocation6 + %s306_s27]]  ;;  %v850_v11 = vld [vmem:[%s1352_s15 + $0x60] sm:$0xff]  ;;  %v849_v20 = vld [vmem:[%s1352_s15 + $0x58] sm:$0xff]  ;;  %v848_v23 = vld [vmem:[%s1352_s15 + $0x50] sm:$0xff]  ;;  %s576_s24 = scalar_lea.sflag [#allocation9], %s266_s4 }
  0x50   : > { %530 = vmatpush.bf16.msra.mxu0 %v844_v4  ;;  %v858_v12 = vld [vmem:[%s1352_s15 + $0xa0] sm:$0xff]  ;;  %v857_v21 = vld [vmem:[%s1352_s15 + $0x98] sm:$0xff]  ;;  %v856_v24 = vld [vmem:[%s1352_s15 + $0x90] sm:$0xff]  ;;  %s583_s21 = sld [smem:[%s871_s18 + %s1497_s12]]  ;;  %s591_s12 = sshll.u32 %s1370_s16, 4  ;;  %s592_s12 = int_to_ptr.vmem [resolvable:$true] %s591_s12 }
  0x51   : > { %544 = vmatpush.bf16.msra.mxu1 %v852_v5  ;;  %v839_v25 = vld [vmem:[%s1352_s15 + $0x8] sm:$0xff]  ;;  %v838_v28 = vld [vmem:[%s1352_s15] sm:$0xff] }
  0x52   : > { %558 = vmatpush.bf16.msra.mxu2 %v860_v6  ;;  %v847_v26 = vld [vmem:[%s1352_s15 + $0x48] sm:$0xff]  ;;  %v846_v29 = vld [vmem:[%s1352_s15 + $0x40] sm:$0xff] }
  0x53   : > { %s832_s7 = sshll.u32 %s289_s22, 3  ;;  %v855_v27 = vld [vmem:[%s1352_s15 + $0x88] sm:$0xff]  ;;  %v854_v34 = vld [vmem:[%s1352_s15 + $0x80] sm:$0xff] }
  0x54   : > { %s833_s8 = sshll.u32 %s298_s26, 3  ;;  %531 = vmatpush.bf16.msra.mxu0 %v843_v7  ;;  %s292_s29 = scalar_lea.vmem [#allocation10], %s832_s7  ;;  %v315_v43 = vld [vmem:[%s1370_s16] sm:$0xff]  ;;  %v316_v50 = vld [vmem:[%s1370_s16 + $0x8] sm:$0xff] }
  0x55   : > { %545 = vmatpush.bf16.msra.mxu1 %v851_v8  ;;  %v293_v13 = vld [vmem:[%s292_s29] sm:$0xf]  ;;  %v294_v14 = vld [vmem:[%s292_s29 + $0x4] sm:$0xf]  ;;  %s834_s28 = sshll.u32 %s307_s10, 3  ;;  %s301_s0 = scalar_lea.vmem [#allocation10], %s833_s8 }
  0x56   : > { %559 = vmatpush.bf16.msra.mxu2 %v859_v9  ;;  %295 = vst [vmem:[#allocation2] sm:$0xf] %v293_v13  ;;  %v302_v15 = vld [vmem:[%s301_s0] sm:$0xf]  ;;  %v303_v16 = vld [vmem:[%s301_s0 + $0x4] sm:$0xf] }
  0x57   : > { %296 = vst [vmem:[#allocation2 + $0xc] sm:$0xf] %v294_v14  ;;  %s310_s13 = scalar_lea.vmem [#allocation10], %s834_s28  ;;  %s829_s15 = sshll.u32 %s583_s21, 3 }
  0x58   : > { %304 = vst [vmem:[#allocation2 + $0x4] sm:$0xf] %v302_v15  ;;  %v311_v17 = vld [vmem:[%s310_s13] sm:$0xf]  ;;  %v312_v18 = vld [vmem:[%s310_s13 + $0x4] sm:$0xf]  ;;  %532 = vmatpush.bf16.msra.mxu0 %v842_v10  ;;  %s590_s17 = scalar_lea.hbm %s1459_s6, %s829_s15 }
  0x59   : > { %546 = vmatpush.bf16.msra.mxu1 %v850_v11  ;;  %305 = vst [vmem:[#allocation2 + $0x10] sm:$0xf] %v303_v16  ;;  %s593_s22 = sshll.u32 %s590_s17, 4  ;;  %s1089_s8 = scalar_lea.hbm %s1459_s6, 48  ;;  %s594_s22 = int_to_ptr.hbm [resolvable:$true] %s593_s22 }
  0x5a   : > { %560 = vmatpush.bf16.msra.mxu2 %v858_v12  ;;  %313 = vst [vmem:[#allocation2 + $0x8] sm:$0xf] %v311_v17  ;;  %s1083_s26 = sshra.s32 %s594_s22, 4  ;;  %s1084_s26 = int_to_ptr.hbm [resolvable:$true] %s1083_s26 }
  0x5b   : > { %314 = vst [vmem:[#allocation2 + $0x14] sm:$0xf] %v312_v18  ;;  %s1085_s27 = scalar_lea.hbm %s1084_s26, 16  ;;  %p1090_p2 = scmp.lt.s32.totalorder %s1084_s26, %s1459_s6 }
  0x5c   : > { %533 = vmatpush.bf16.msra.mxu0 %v841_v19  ;;  %p1086_p1 = scmp.ne.s32.totalorder %s1084_s26, %s1085_s27  ;;  %p1091_p4 = scmp.lt.s32.totalorder %s1089_s8, %s1085_s27 }
  0x5d   : > { %547 = vmatpush.bf16.msra.mxu1 %v849_v20  ;;  %v722_v30 = vld [vmem:[#allocation2] sm:$0xf] }
  0x5e   : > { %561 = vmatpush.bf16.msra.mxu2 %v857_v21  ;;  %v836_v31 = vld [vmem:[#allocation2 + $0x8] sm:$0xf0]  ;;  %p1087_p13 = pnand %p1086_p1, %p1297_p7  ;;  %p1092_p5 = por %p1091_p4, %p1090_p2 }
  0x5f   : > { %v835_v32 = vld [vmem:[#allocation2 + $0x4] sm:$0xf]  ;;  %v723_v37 = vor.u32 %v836_v31, %v722_v30 }
  0x60   : > { %534 = vmatpush.bf16.msra.mxu0 %v840_v22  ;;  %v724_v33 = vld [vmem:[#allocation2 + $0xc] sm:$0xf0]  ;;  %p1088_p0 = pneg %p1087_p13 }
  0x61   : > { %548 = vmatpush.bf16.msra.mxu1 %v848_v23  ;;  %v730_v35 = vld [vmem:[#allocation2 + $0x8] sm:$0xf]  ;;  %v727_v38 = vor.u32 %v835_v32, %v724_v33 }
  0x62   : > { %562 = vmatpush.bf16.msra.mxu2 %v856_v24  ;;  %v837_v36 = vld [vmem:[#allocation2 + $0x10] sm:$0xf0]  ;;  %p1093_p6 = pnand %p1092_p5, %p1088_p0 }
  0x63   : > { %v731_v39 = vor.u32 %v837_v36, %v730_v35 }
  0x64   : > { %535 = vmatpush.bf16.msra.mxu0 %v839_v25 }
  0x65   : > { %549 = vmatpush.bf16.msra.mxu1 %v847_v26 }
  0x66   : > { %563 = vmatpush.bf16.msra.mxu2 %v855_v27 }
  0x68   : > { %536 = vmatpush.bf16.msra.mxu0 %v838_v28 }
  0x69   : > { %550 = vmatpush.bf16.msra.mxu1 %v846_v29 }
  0x6a   : > { %564 = vmatpush.bf16.msra.mxu2 %v854_v34 }
  0x6b   : > { %537 = vmatmul.bf16.vlgmr.msra.gmra.mxu0 %v723_v37 }
  0x6c   : > { %551 = vmatmul.bf16.vlgmr.msra.gmra.mxu1 %v727_v38 }
  0x6d   : > { %565 = vmatmul.bf16.vlgmr.msra.gmra.mxu2 %v731_v39 }
  0xe8   : > { %v538_v40 = vpop.f32.mrf.mxu0 }
  0xe9   : > { %v552_v41 = vpop.f32.mrf.mxu1 }
  0xea   : > { %v553_v42 = vadd.f32 %v552_v41, %v538_v40 }
  0xf0   : > { %v566_v44 = vpop.f32.mrf.mxu2  ;;  %v540_v47 = vpop.f32.mrf.mxu0 }
  0xf1   : > { %v567_v45 = vadd.f32 %v566_v44, %v553_v42  ;;  %v554_v48 = vpop.f32.mrf.mxu1 }
  0xf2   : > { %v555_v49 = vadd.f32 %v554_v48, %v540_v47 }
  0xf3   : > { %v571_v46 = vadd.f32 %v567_v45, %v315_v43 }
  0xf5   : > { %573 = vst [vmem:[%s1370_s16] sm:$0xff] %v571_v46 }
  0xf8   : > { %v568_v51 = vpop.f32.mrf.mxu2 }
  0xf9   : > { %v569_v52 = vadd.f32 %v568_v51, %v555_v49 }
  0xfb   : > { %v572_v53 = vadd.f32 %v569_v52, %v316_v50 }
  0xfd   : > { %574 = vst [vmem:[%s1370_s16 + $0x8] sm:$0xff] %v572_v53 }
  0xfe   : > { %1096 = shalt.err (!%p1093_p6)
}
  0xff   : > { %s1189_s4 = smov 128   ;;  %s1190_s16 = smov 384  }
 0x100   : > { %s1191_s0 = smov 8  }
 0x101   : > { %873 = dma.vmem_to_hbm [thread:$0]  (%p1297_p7), %s592_s12, 256, %s594_s22, %s576_s24, %s1189_s4, %s1190_s16, %s1191_s0  }
 0x102 PF: > { %s1482_s13 = sld [smem:[#allocation18_spill]]  ;;  %p890_p8 = scmp.ge.s32.totalorder %s1181_s14, 2 }
 0x104   : > { %p884_p10 = pnand %p890_p8, %p1302_p9 }
 0x106   : > { %p885_p12 = pneg %p884_p10 }
 0x108   : > { %s608_s21 = sand.u32 1, %s1482_s13  }
 0x109   : > { %s609_s15 = scalar_lea.sflag [#allocation9], %s608_s21 }
 0x10a   : > { %1144 = dma.done.wait (%p885_p12), %s609_s15, 256  }
 0x10b   : > { %1146 = vsyncadd (%p885_p12), %s609_s15, 4294967040  ;;  %s41_s14 = sadd.s32 1, %s1181_s14   ;;  %s1484_s12 = sld [smem:[#allocation19_spill]] }
 0x10c   : > { %p38_p11 = scmp.ge.s32.totalorder %s41_s14, 5   ;;  %s1485_s13 = sld [smem:[#allocation21_spill]] }
 0x10d   : > { %s1486_s0 = smov %s1153_s1  ;;  %s1487_s1 = smov %s1157_s9 }
 0x10e   : > { %s1488_s9 = smov %s1344_s30  ;;  %s1489_s10 = smov %s1165_s2 }
 0x10f   : > { %s1490_s2 = smov %s1169_s11  ;;  %s1491_s11 = smov %s1336_s23 }
 0x110   :  { %40 = sbr.rel (!%p38_p11) target bundleno = 19 (0x13), region = 92 }
 0x115   :  { %615 = vsyncpa [#allocation8], 1 }
 0x116   :  { %617 = vsyncpa [#allocation8 + $0x1], 1 }
 0x117   :  { %618 = vsyncpa [#allocation11], 1 }
 0x118   :  { %619 = vsyncpa [#allocation9], 1 }
 0x119   :  { %621 = vsyncpa [#allocation9 + $0x1], 1 }

</bundles_post_ra>
